<compile_context>
chip_gen: v6e
topology: v6e:2x2x1
jax: 0.10.0
libtpu: 0.0.40
codegen_flags: <defaults>
</compile_context>

<pallas_src>
import jax
import jax.numpy as jnp
from jax.experimental import pallas as pl
from jax.experimental.pallas import tpu as pltpu


def _round_up(x, m):
    return (x + m - 1) // m * m


def _cdiv(a, b):
    return -(-a // b)


def qnetwork_kernel(x_ref, w1_ref, b1_ref, w2_ref, b2_ref, w3_ref, b3_ref, o_ref):
    # x_ref: (TB, 91) f32 (raw input tile). Weights bf16 (in, out), biases f32 (1, out).
    # All three matmuls + ReLUs fused; intermediates live in vregs/VMEM.
    x = x_ref[...].astype(jnp.bfloat16)                                   # (TB, 91) bf16
    h1 = jnp.dot(x, w1_ref[...], preferred_element_type=jnp.float32)      # (TB, 64) f32
    h1 = jnp.maximum(h1 + b1_ref[...], 0.0)
    h2 = jnp.dot(h1.astype(jnp.bfloat16), w2_ref[...],
                 preferred_element_type=jnp.float32)                      # (TB, 64) f32
    h2 = jnp.maximum(h2 + b2_ref[...], 0.0)
    h3 = jnp.dot(h2.astype(jnp.bfloat16), w3_ref[...],
                 preferred_element_type=jnp.float32)                      # (TB, 8) f32
    o_ref[...] = (h3 + b3_ref[...]).astype(o_ref.dtype)


def _choose_tiling(B, block_b):
    """Pick (TB, B_pad): TB multiple of 16, >=2 (even) grid steps when the batch allows,
    each step at most ~block_b rows, pad waste bounded by one tile (tiny in practice)."""
    B16 = _round_up(max(B, 16), 16)
    n_groups = B16 // 16
    if n_groups == 1:
        return 16, 16
    n_steps = max(2, _cdiv(B16, block_b))
    if n_steps % 2:                       # even step count load-balances the 2 TCs on v7x
        n_steps += 1
    n_steps = min(n_steps, n_groups)
    TB = 16 * _cdiv(n_groups, n_steps)
    B_pad = _round_up(B16, TB)
    return TB, B_pad


def prepare_params(params):
    """Hoisted, one-time weight prep: bf16 casts + action-dim pad 3 -> 8.
    Call once per parameter update; reuse the result across forward calls."""
    w3 = params["w3"]
    b3 = params["b3"]
    H2, A = w3.shape
    A_pad = _round_up(A, 8)
    w3p = jnp.zeros((H2, A_pad), jnp.bfloat16).at[:, :A].set(w3.astype(jnp.bfloat16))
    b3p = jnp.zeros((1, A_pad), jnp.float32).at[:, :A].set(b3.astype(jnp.float32))
    return (params["w1"].astype(jnp.bfloat16), params["b1"].astype(jnp.float32),
            params["w2"].astype(jnp.bfloat16), params["b2"].astype(jnp.float32),
            w3p, b3p)


def qnetwork_forward(state, prepped, *, action_size=3, block_b=2048):
    """state: (B, state_size) f32.  prepped: output of prepare_params()."""
    w1, b1, w2, b2, w3p, b3p = prepped
    B, S = state.shape
    H1 = w1.shape[1]
    H2 = w2.shape[1]
    A_pad = w3p.shape[1]

    TB, B_pad = _choose_tiling(B, block_b)
    if B_pad != B:
        # Row pad only (zeros). No feature-dim pad, no wrapper-side cast/copy of x.
        state = jnp.pad(state, ((0, B_pad - B), (0, 0)))

    grid = (B_pad // TB,)
    const = lambda i: (0, 0)

    flops = 2 * B_pad * (S * H1 + H1 * H2 + H2 * A_pad)
    bytes_accessed = (B_pad * S * 4                      # raw f32 x read
                      + B_pad * A_pad * 4                # (B_pad, 8) f32 out write
                      + (S * H1 + H1 * H2 + H2 * A_pad) * 2   # bf16 weights (read once)
                      + (H1 + H2 + A_pad) * 4)           # f32 biases

    out = pl.pallas_call(
        qnetwork_kernel,
        out_shape=jax.ShapeDtypeStruct((B_pad, A_pad), jnp.float32),
        grid=grid,
        in_specs=[
            pl.BlockSpec((TB, S), lambda i: (i, 0)),     # x tile, streamed (91 = full dim)
            pl.BlockSpec((S, H1), const),                # weights/biases: VMEM-resident
            pl.BlockSpec((1, H1), const),
            pl.BlockSpec((H1, H2), const),
            pl.BlockSpec((1, H2), const),
            pl.BlockSpec((H2, A_pad), const),
            pl.BlockSpec((1, A_pad), const),
        ],
        out_specs=pl.BlockSpec((TB, A_pad), lambda i: (i, 0)),
        compiler_params=pltpu.CompilerParams(
            dimension_semantics=("parallel",)),
        cost_estimate=pl.CostEstimate(flops=flops, transcendentals=0,
                                      bytes_accessed=bytes_accessed),
    )(state, w1, b1, w2, b2, w3p, b3p)

    return out[:B, :action_size]


def init_params(key, state_size=91, fc1_units=64, fc2_units=64, action_size=3):
    """Deterministic init mimicking PyTorch nn.Linear default (uniform +-1/sqrt(fan_in))."""
    def linear(k, fan_in, fan_out):
        kw, kb = jax.random.split(k)
        bound = 1.0 / jnp.sqrt(jnp.float32(fan_in))
        w = jax.random.uniform(kw, (fan_in, fan_out), jnp.float32, -bound, bound)
        b = jax.random.uniform(kb, (1, fan_out), jnp.float32, -bound, bound)
        return w, b

    k1, k2, k3 = jax.random.split(key, 3)
    w1, b1 = linear(k1, state_size, fc1_units)
    w2, b2 = linear(k2, fc1_units, fc2_units)
    w3, b3 = linear(k3, fc2_units, action_size)
    return {"w1": w1, "b1": b1, "w2": w2, "b2": b2, "w3": w3, "b3": b3}


def qnetwork_ref_f32(state, p):
    h1 = jnp.maximum(state @ p["w1"] + p["b1"], 0.0)
    h2 = jnp.maximum(h1 @ p["w2"] + p["b2"], 0.0)
    return h2 @ p["w3"] + p["b3"]


def qnetwork_ref_bf16(state, p):
    # Mirrors the kernel numerics: bf16 matmul operands, f32 accumulation + elementwise.
    h1 = jnp.dot(state.astype(jnp.bfloat16), p["w1"].astype(jnp.bfloat16),
                 preferred_element_type=jnp.float32) + p["b1"]
    h1 = jnp.maximum(h1, 0.0)
    h2 = jnp.dot(h1.astype(jnp.bfloat16), p["w2"].astype(jnp.bfloat16),
                 preferred_element_type=jnp.float32) + p["b2"]
    h2 = jnp.maximum(h2, 0.0)
    return jnp.dot(h2.astype(jnp.bfloat16), p["w3"].astype(jnp.bfloat16),
                   preferred_element_type=jnp.float32) + p["b3"]


if __name__ == "__main__":
    key = jax.random.PRNGKey(0)
    kp, kx1, kx2 = jax.random.split(key, 3)

    state_size, action_size = 91, 3
    params = init_params(kp, state_size=state_size, action_size=action_size)
    prepped = prepare_params(params)          # one-time weight prep (hoisted out of fwd)

    fwd = jax.jit(qnetwork_forward, static_argnames=("action_size", "block_b"))

    # Case 1: batch 32 -> TB=16, grid of 2 "parallel" steps (pipelining / 2-TC path).
    state_a = jax.random.normal(kx1, (32, state_size), jnp.float32)
    out_a = jax.block_until_ready(fwd(state_a, prepped, action_size=action_size))
    assert out_a.shape == (32, action_size)
    assert jnp.allclose(out_a, qnetwork_ref_bf16(state_a, params), atol=2e-4, rtol=2e-4)
    assert jnp.allclose(out_a, qnetwork_ref_f32(state_a, params), atol=5e-2, rtol=5e-2)

    # Case 2: small ragged batch (5 rows) exercising the row-pad + slice path.
    state_b = jax.random.normal(kx2, (5, state_size), jnp.float32)
    out_b = jax.block_until_ready(fwd(state_b, prepped, action_size=action_size))
    assert out_b.shape == (5, action_size)
    assert jnp.allclose(out_b, qnetwork_ref_bf16(state_b, params), atol=2e-4, rtol=2e-4)
    assert jnp.allclose(out_b, qnetwork_ref_f32(state_b, params), atol=5e-2, rtol=5e-2)

    print("KERNEL_OK")
</pallas_src>

<mosaic_0001>
module attributes {stable_mosaic.version = 11 : i64} {
  func.func @qnetwork_kernel(%arg0: i32, %arg1: memref<16x91xf32, #tpu.memory_space<vmem>>, %arg2: memref<91x64xbf16, #tpu.memory_space<vmem>>, %arg3: memref<1x64xf32, #tpu.memory_space<vmem>>, %arg4: memref<64x64xbf16, #tpu.memory_space<vmem>>, %arg5: memref<1x64xf32, #tpu.memory_space<vmem>>, %arg6: memref<64x8xbf16, #tpu.memory_space<vmem>>, %arg7: memref<1x8xf32, #tpu.memory_space<vmem>>, %arg8: memref<16x8xf32, #tpu.memory_space<vmem>>) attributes {dimension_semantics = [#tpu.dimension_semantics<parallel>], iteration_bounds = array<i64: 2>, scalar_prefetch = 0 : i64, scratch_operands = 0 : i64, tpu.core_type = #tpu.core_type<tc>, window_params = [{transform_indices = @transform_0, window_bounds = array<i64: 16, 91>}, {pipeline_mode = #tpu.pipeline_mode<synchronous>, transform_indices = @transform_1, window_bounds = array<i64: 91, 64>}, {pipeline_mode = #tpu.pipeline_mode<synchronous>, transform_indices = @transform_2, window_bounds = array<i64: 1, 64>}, {pipeline_mode = #tpu.pipeline_mode<synchronous>, transform_indices = @transform_3, window_bounds = array<i64: 64, 64>}, {pipeline_mode = #tpu.pipeline_mode<synchronous>, transform_indices = @transform_4, window_bounds = array<i64: 1, 64>}, {pipeline_mode = #tpu.pipeline_mode<synchronous>, transform_indices = @transform_5, window_bounds = array<i64: 64, 8>}, {pipeline_mode = #tpu.pipeline_mode<synchronous>, transform_indices = @transform_6, window_bounds = array<i64: 1, 8>}, {transform_indices = @transform_7, window_bounds = array<i64: 16, 8>}]} {
    %c0 = arith.constant 0 : index
    %c0_0 = arith.constant 0 : index
    %0 = vector.load %arg1[%c0, %c0_0] : memref<16x91xf32, #tpu.memory_space<vmem>>, vector<16x91xf32>
    %1 = arith.truncf %0 : vector<16x91xf32> to vector<16x91xbf16>
    %c0_1 = arith.constant 0 : index
    %c0_2 = arith.constant 0 : index
    %2 = vector.load %arg2[%c0_1, %c0_2] : memref<91x64xbf16, #tpu.memory_space<vmem>>, vector<91x64xbf16>
    %cst = arith.constant dense<0.000000e+00> : vector<16x64xf32>
    %3 = tpu.matmul %1, %2, %cst {dimension_numbers = #tpu.dot_dimension_numbers<[1], [0], [0], [1], [0, 0, 1, 1], [], []>} : vector<16x91xbf16>, vector<91x64xbf16>, vector<16x64xf32> -> vector<16x64xf32>
    %c0_3 = arith.constant 0 : index
    %c0_4 = arith.constant 0 : index
    %4 = vector.load %arg3[%c0_3, %c0_4] : memref<1x64xf32, #tpu.memory_space<vmem>>, vector<1x64xf32>
    %5 = vector.broadcast %4 : vector<1x64xf32> to vector<16x64xf32>
    %6 = arith.addf %3, %5 : vector<16x64xf32>
    %cst_5 = arith.constant 0.000000e+00 : f32
    %7 = vector.broadcast %cst_5 : f32 to vector<16x64xf32>
    %8 = arith.maximumf %6, %7 : vector<16x64xf32>
    %9 = arith.truncf %8 : vector<16x64xf32> to vector<16x64xbf16>
    %c0_6 = arith.constant 0 : index
    %c0_7 = arith.constant 0 : index
    %10 = vector.load %arg4[%c0_6, %c0_7] : memref<64x64xbf16, #tpu.memory_space<vmem>>, vector<64x64xbf16>
    %cst_8 = arith.constant dense<0.000000e+00> : vector<16x64xf32>
    %11 = tpu.matmul %9, %10, %cst_8 {dimension_numbers = #tpu.dot_dimension_numbers<[1], [0], [0], [1], [0, 0, 1, 1], [], []>} : vector<16x64xbf16>, vector<64x64xbf16>, vector<16x64xf32> -> vector<16x64xf32>
    %c0_9 = arith.constant 0 : index
    %c0_10 = arith.constant 0 : index
    %12 = vector.load %arg5[%c0_9, %c0_10] : memref<1x64xf32, #tpu.memory_space<vmem>>, vector<1x64xf32>
    %13 = vector.broadcast %12 : vector<1x64xf32> to vector<16x64xf32>
    %14 = arith.addf %11, %13 : vector<16x64xf32>
    %cst_11 = arith.constant 0.000000e+00 : f32
    %15 = vector.broadcast %cst_11 : f32 to vector<16x64xf32>
    %16 = arith.maximumf %14, %15 : vector<16x64xf32>
    %17 = arith.truncf %16 : vector<16x64xf32> to vector<16x64xbf16>
    %c0_12 = arith.constant 0 : index
    %c0_13 = arith.constant 0 : index
    %18 = vector.load %arg6[%c0_12, %c0_13] : memref<64x8xbf16, #tpu.memory_space<vmem>>, vector<64x8xbf16>
    %cst_14 = arith.constant dense<0.000000e+00> : vector<16x8xf32>
    %19 = tpu.matmul %17, %18, %cst_14 {dimension_numbers = #tpu.dot_dimension_numbers<[1], [0], [0], [1], [0, 0, 1, 1], [], []>} : vector<16x64xbf16>, vector<64x8xbf16>, vector<16x8xf32> -> vector<16x8xf32>
    %c0_15 = arith.constant 0 : index
    %c0_16 = arith.constant 0 : index
    %20 = vector.load %arg7[%c0_15, %c0_16] : memref<1x8xf32, #tpu.memory_space<vmem>>, vector<1x8xf32>
    %21 = vector.broadcast %20 : vector<1x8xf32> to vector<16x8xf32>
    %22 = arith.addf %19, %21 : vector<16x8xf32>
    %c0_17 = arith.constant 0 : index
    %c0_18 = arith.constant 0 : index
    %23 = vector.load %arg8[%c0_17, %c0_18] : memref<16x8xf32, #tpu.memory_space<vmem>>, vector<16x8xf32>
    tpu.vector_store %arg8[%c0_17, %c0_18], %22 {strides = array<i32>} : memref<16x8xf32, #tpu.memory_space<vmem>>, vector<16x8xf32>,
    return
  }
  func.func @transform_0(%arg0: i32) -> (i32, i32) {
    %c0_i32 = arith.constant 0 : i32
    %c0_i32_0 = arith.constant 0 : i32
    return %arg0, %c0_i32 : i32, i32
  }
  func.func @transform_1(%arg0: i32) -> (i32, i32) {
    %c0_i32 = arith.constant 0 : i32
    %c0_i32_0 = arith.constant 0 : i32
    %c0_i32_1 = arith.constant 0 : i32
    return %c0_i32, %c0_i32_0 : i32, i32
  }
  func.func @transform_2(%arg0: i32) -> (i32, i32) {
    %c0_i32 = arith.constant 0 : i32
    %c0_i32_0 = arith.constant 0 : i32
    %c0_i32_1 = arith.constant 0 : i32
    return %c0_i32, %c0_i32_0 : i32, i32
  }
  func.func @transform_3(%arg0: i32) -> (i32, i32) {
    %c0_i32 = arith.constant 0 : i32
    %c0_i32_0 = arith.constant 0 : i32
    %c0_i32_1 = arith.constant 0 : i32
    return %c0_i32, %c0_i32_0 : i32, i32
  }
  func.func @transform_4(%arg0: i32) -> (i32, i32) {
    %c0_i32 = arith.constant 0 : i32
    %c0_i32_0 = arith.constant 0 : i32
    %c0_i32_1 = arith.constant 0 : i32
    return %c0_i32, %c0_i32_0 : i32, i32
  }
  func.func @transform_5(%arg0: i32) -> (i32, i32) {
    %c0_i32 = arith.constant 0 : i32
    %c0_i32_0 = arith.constant 0 : i32
    %c0_i32_1 = arith.constant 0 : i32
    return %c0_i32, %c0_i32_0 : i32, i32
  }
  func.func @transform_6(%arg0: i32) -> (i32, i32) {
    %c0_i32 = arith.constant 0 : i32
    %c0_i32_0 = arith.constant 0 : i32
    %c0_i32_1 = arith.constant 0 : i32
    return %c0_i32, %c0_i32_0 : i32, i32
  }
  func.func @transform_7(%arg0: i32) -> (i32, i32) {
    %c0_i32 = arith.constant 0 : i32
    %c0_i32_0 = arith.constant 0 : i32
    return %arg0, %c0_i32 : i32, i32
  }
}

</mosaic_0001>

<bundles_post_ra>
// kernel: qnetwork_forward.1
= control target key start
LH: loop header
LB: loop body
LE: loop exit
PB: predicated region body
PF: predicated region fallthrough
CT: control target
= control target key end

     0   :  { %s788_s24 = smov 0   ;;  %s885_s0 = inlined_call_operand.vmem [shape: f32[32,91], index: 0, kind: input, shape index: {}]   ;;  %s886_s1 = inlined_call_operand.vmem [shape: bf16[91,64], index: 1, kind: input, shape index: {}]   ;;  %s887_s2 = inlined_call_operand.vmem [shape: f32[1,64], index: 2, kind: input, shape index: {}]   ;;  %s888_s3 = inlined_call_operand.vmem [shape: bf16[64,64], index: 3, kind: input, shape index: {}]   ;;  %s889_s4 = inlined_call_operand.vmem [shape: f32[1,64], index: 4, kind: input, shape index: {}]   ;;  %s890_s5 = inlined_call_operand.vmem [shape: bf16[64,8], index: 5, kind: input, shape index: {}]   ;;  %s891_s6 = inlined_call_operand.vmem [shape: f32[1,8], index: 6, kind: input, shape index: {}]   ;;  %s892_s7 = inlined_call_operand.vmem [shape: f32[32,8], index: 7, kind: output, shape index: {}]  }
   0x1 LB: > { %s624_s25 = sadd.s32 4294967295, %s743_s24   ;;  %p628_p0 = scmp.ge.s32.totalorder %s743_s24, 1  ;;  %s743_s24 = sphi %s788_s24, %s17_s24  }
   0x2   : > { %p238_p1 = scmp.lt.s32.totalorder %s743_s24, 3 }
   0x4   : > { %p239_p2 = pnand %p628_p0, %p238_p1 }
   0x5   : > { %s629_s28 = sshll.u32 (!%p239_p2), %s624_s25, 1 }
   0x6   : > { %242 = sbr.rel (%p239_p2) target bundleno = 645 (0x285), region = 48  ;;  %p271_p3 = scmp.lt.s32.totalorder (!%p239_p2), %s629_s28, 3 }
   0xb   : > { %vm344_vm0 = vcmask 1044480   ;;  %v745_v0 = vmov 0.0   ;;  %v723_v1 = vld [vmem:[%s886_s1 + $0x28] sm:$0x3f]   ;;  %vm345_vm1 = vcmask 1045504   ;;  %v746_v2 = vmov 65535  }
   0xc   : > { %672 = vmatprep.subr.bf16.mxu0 %v745_v0  ;;  %688 = vmatprep.subr.bf16.mxu1 %v745_v0  ;;  %v346_v3 = vsel %vm344_vm0, 4294967295, %v746_v2  ;;  %vm747_vm2 = vmmov 0   ;;  %v724_v6 = vld [vmem:[%s886_s1 + $0x20] sm:$0xff]   ;;  %v729_v7 = vld [vmem:[%s888_s3 + $0x18] sm:$0xff]   ;;  %s894_s28 = smov (!%p271_p3, %s629_s28), 3  ;;  %v726_v9 = vld [vmem:[%s886_s1 + $0x10] sm:$0xff]  }
   0xd   : > { %v347_v4 = vsel %vm345_vm1, %v346_v3, 0  ;;  %684 = vmatprep.mubr.msk.bf16.mxu0 %vm747_vm2, %v745_v0  ;;  %696 = vmatprep.mubr.msk.bf16.mxu1 %vm747_vm2, %v745_v0  ;;  %v725_v8 = vld [vmem:[%s886_s1 + $0x18] sm:$0xff]   ;;  %s630_s14 = sshll.u32 %s894_s28, 3  ;;  %v727_v10 = vld [vmem:[%s886_s1 + $0x8] sm:$0xff]   ;;  %v728_v11 = vld [vmem:[%s886_s1] sm:$0xff]   ;;  %vm340_vm3 = vcmask 744448  }
   0xe   : > { %v349_v5 = vand.u32 %v723_v1, %v347_v4  ;;  %689 = vmatpush3.bf16.msra.mxu1 %v729_v7  ;;  %s274_s19 = scalar_lea.vmem %s885_s0, %s630_s14  ;;  %v730_v15 = vld [vmem:[%s888_s3 + $0x10] sm:$0xff]   ;;  %v731_v16 = vld [vmem:[%s888_s3 + $0x8] sm:$0xff]   ;;  %v732_v17 = vld [vmem:[%s888_s3] sm:$0xff]   ;;  %vm434_vm4 = vcmask 523264   ;;  %s280_s25 = scalar_lea.vmem %s892_s7, %s630_s14  ;;  %vm565_vm5 = vcmask 64512  }
   0xf   : > { %690 = vmatprep.subr.bf16.mxu1 %v745_v0  ;;  %v283_v12 = vld [vmem:[%s274_s19] sm:$0xff]  ;;  %v284_v13 = vld [vmem:[%s274_s19 + $0x8] sm:$0xff]  ;;  %v733_v27 = vld [vmem:[%s890_s5 + $0x18] sm:$0xff]  }
  0x10   : > { %673 = vmatpush3.bf16.msra.mxu0 %v349_v5  ;;  %v285_v14 = vpack.c.bf16 %v284_v13, %v283_v12  ;;  %v633_v18 = vld [vmem:[%s887_s2] ss:$0 sm:$0xff]  ;;  %v734_v29 = vld [vmem:[%s890_s5 + $0x10] sm:$0xff]   ;;  %v735_v30 = vld [vmem:[%s890_s5 + $0x8] sm:$0xff]  }
  0x11   : > { %674 = vmatprep.subr.bf16.mxu0 %v745_v0  ;;  %v736_v31 = vld [vmem:[%s890_s5] sm:$0xff]  }
  0x12   : > { %691 = vmatpush3.bf16.msra.mxu1 %v730_v15  ;;  %v641_v32 = vld [vmem:[%s889_s4] ss:$0 sm:$0xff] }
  0x13   : > { %692 = vmatprep.subr.bf16.mxu1 %v745_v0  ;;  %v647_v42 = vld [vmem:[%s891_s6] ss:$0 sm:$0xff] }
  0x14   : > { %675 = vmatpush3.bf16.msra.mxu0 %v724_v6 }
  0x15   : > { %676 = vmatprep.subr.bf16.mxu0 %v745_v0 }
  0x16   : > { %693 = vmatpush3.bf16.msra.mxu1 %v731_v16 }
  0x17   : > { %694 = vmatprep.subr.bf16.mxu1 %v745_v0 }
  0x18   : > { %677 = vmatpush3.bf16.msra.mxu0 %v725_v8 }
  0x19   : > { %678 = vmatprep.subr.bf16.mxu0 %v745_v0 }
  0x1a   : > { %695 = vmatpush3.bf16.msra.mxu1 %v732_v17 }
  0x1b   : > { %700 = vmatprep.subr.bf16.mxu1 %v745_v0 }
  0x1c   : > { %679 = vmatpush3.bf16.msra.mxu0 %v726_v9 }
  0x1d   : > { %680 = vmatprep.subr.bf16.mxu0 %v745_v0 }
  0x20   : > { %681 = vmatpush3.bf16.msra.mxu0 %v727_v10 }
  0x21   : > { %682 = vmatprep.subr.bf16.mxu0 %v745_v0 }
  0x24   : > { %683 = vmatpush3.bf16.msra.mxu0 %v728_v11 }
  0x27   : > { %685 = vmatmul.mubr.msk.bf16.vlgmr.msra.gmra.mxu0 %vm340_vm3, %v285_v14 }
  0xe7   : > { %v385_v19 = vpop.f32.mrf.mxu0 }
  0xe8   : > { %v386_v21 = vadd.f32 %v633_v18, %v385_v19 }
  0xe9   : > { %v686_v20 = vpop.f32.mrf.mxu0 }
  0xea   : > { %v392_v25 = vmax.f32 %v386_v21, 0.0 }
  0xeb   : > { %v388_v22 = vpop.f32.mrf.mxu0 }
  0xec   : > { %v389_v23 = vadd.f32 %v633_v18, %v388_v22 }
  0xed   : > { %v687_v24 = vpop.f32.mrf.mxu0 }
  0xee   : > { %v393_v26 = vmax.f32 %v389_v23, 0.0 }
  0xf0   : > { %v394_v28 = vpack.c.bf16 %v393_v26, %v392_v25 }
  0xf2   : > { %697 = vmatmul.mubr.msk.bf16.vlgmr.msra.gmra.mxu1 %vm434_vm4, %v394_v28 }
  0xf3   : > { %701 = vmatpush3.bf16.msra.mxu1 %v733_v27  ;;  %708 = vmatprep.mubr.msk.bf16.mxu1 %vm747_vm2, %v745_v0 }
  0xf4   : > { %702 = vmatprep.subr.bf16.mxu1 %v745_v0 }
  0xf7   : > { %703 = vmatpush3.bf16.msra.mxu1 %v734_v29 }
  0xf8   : > { %704 = vmatprep.subr.bf16.mxu1 %v745_v0 }
  0xfb   : > { %705 = vmatpush3.bf16.msra.mxu1 %v735_v30 }
  0xfc   : > { %706 = vmatprep.subr.bf16.mxu1 %v745_v0 }
  0xff   : > { %707 = vmatpush3.bf16.msra.mxu1 %v736_v31 }
 0x1b2   : > { %v472_v33 = vpop.f32.mrf.mxu1 }
 0x1b3   : > { %v473_v35 = vadd.f32 %v641_v32, %v472_v33 }
 0x1b4   : > { %v698_v34 = vpop.f32.mrf.mxu1 }
 0x1b5   : > { %v479_v39 = vmax.f32 %v473_v35, 0.0 }
 0x1b6   : > { %v475_v36 = vpop.f32.mrf.mxu1 }
 0x1b7   : > { %v476_v37 = vadd.f32 %v641_v32, %v475_v36 }
 0x1b8   : > { %v699_v38 = vpop.f32.mrf.mxu1 }
 0x1b9   : > { %v480_v40 = vmax.f32 %v476_v37, 0.0 }
 0x1bb   : > { %v481_v41 = vpack.c.bf16 %v480_v40, %v479_v39 }
 0x1bd   : > { %709 = vmatmul.mubr.msk.bf16.vlgmr.msra.gmra.mxu1 %vm434_vm4, %v481_v41 }
 0x27d   : > { %v558_v43 = vpop.f32.mrf.mxu1 }
 0x27e   : > { %v559_v44 = vadd.f32 %v647_v42, %v558_v43 }
 0x27f   : > { %v710_v45 = vpop.f32.mrf.mxu1 }
 0x280   : > { %566 = vst.msk [vmem:[%s280_s25] sm:$0xff] %vm565_vm5, %v559_v44 }
 0x281   : > { %v561_v46 = vpop.f32.mrf.mxu1 }
 0x282   : > { %v562_v47 = vadd.f32 %v647_v42, %v561_v46 }
 0x283   : > { %v711_v48 = vpop.f32.mrf.mxu1 }
 0x284   : > { %567 = vst.msk [vmem:[%s280_s25 + $0x8] sm:$0xff] %vm565_vm5, %v562_v47 }
 0x285 PF: > { %s17_s24 = sadd.s32 1, %s743_s24  }
 0x286   : > { %p14_p4 = scmp.ge.s32.totalorder %s17_s24, 4  }
 0x288   :  { %16 = sbr.rel (!%p14_p4) target bundleno = 1 (0x1), region = 78 }

</bundles_post_ra>
